<compile_context>
chip_gen: v7x
topology: tpu7x:2x2x1
jax: 0.10.0
libtpu: 0.0.40
codegen_flags: <defaults>
</compile_context>

<pallas_src>
import jax
import jax.numpy as jnp
import jax.scipy.linalg as jsl
import numpy as np
from jax.experimental import pallas as pl
from jax.experimental.pallas import tpu as pltpu

P = 3   # number of meta-paths
N = 64  # number of target nodes
D = 32  # hidden size


def fused_mp_kernel(a_ref, hblk_ref, params_ref, z_ref):
    """Single-shot kernel: GraphConv + PReLU + attention logits + softmax + fuse."""
    N_, D_ = z_ref.shape
    PD = hblk_ref.shape[1]          # P * D
    P_ = PD // D_

    # --- carve the packed parameter buffer (static slices, zero cost) ---
    w_blk   = params_ref[0:PD, :]               # (P*D, P*D) block-diag GraphConv weights
    wfc_blk = params_ref[PD:2 * PD, :]          # (P*D, P*D) block-diag Wfc^T (shared fc)
    vec     = params_ref[2 * PD:2 * PD + 4, :]  # 4 packed row vectors
    b_row, bfc_row, att_row, alpha_row = vec[0:1], vec[1:2], vec[2:3], vec[3:4]

    # --- (1) neighbor aggregation for all meta-paths: ONE MXU pass ---
    # agg[:, p*D:(p+1)*D] = A_hat_p @ h     (hblk is block-diag(h, ..., h))
    agg = jnp.dot(a_ref[...], hblk_ref[...], preferred_element_type=jnp.float32)   # (N, P*D)

    # --- (2) GraphConv weight + bias + PReLU, lane-packed (N, P*D) ---
    x = jnp.dot(agg, w_blk, preferred_element_type=jnp.float32) + b_row
    emb = jnp.where(x > 0, x, alpha_row * x)                                        # shared PReLU alpha

    # --- (3) semantic-attention logits: shared Wfc fused across paths ---
    t = jnp.tanh(jnp.dot(emb, wfc_blk, preferred_element_type=jnp.float32) + bfc_row)
    # att_row already has the row-mean 1/N folded in (done in the wrapper).
    colsum = att_row * jnp.sum(t, axis=0, keepdims=True)                            # (1, P*D)
    logits = [jnp.sum(colsum[:, p * D_:(p + 1) * D_], keepdims=True)                # (1, 1) each
              for p in range(P_)]

    # --- (4) softmax over the P meta-path logits ---
    m = logits[0]
    for lg in logits[1:]:
        m = jnp.maximum(m, lg)
    exps = [jnp.exp(lg - m) for lg in logits]
    denom = exps[0]
    for e in exps[1:]:
        denom = denom + e
    inv_denom = pl.reciprocal(denom)
    # TODO(synk): the torch module prints beta here; host-side print omitted.

    # --- (5) fuse: z = (sum_p exp_p * emb_p) * inv_denom (single final scale) ---
    z = exps[0] * emb[:, 0:D_]
    for p in range(1, P_):
        z = z + exps[p] * emb[:, p * D_:(p + 1) * D_]
    z_ref[...] = z * inv_denom


def mp_encoder_forward(a_hat, h, W, b, prelu_alpha, Wfc, bfc, att):
    """Eval-mode Mp_encoder forward (attn_drop is assumed 0, i.e. identity).

    a_hat: (P, N, N) 'both'-normalized dense adjacency per meta-path.
    h:     (N, D) node features.  W/b: per-path GraphConv params.
    prelu_alpha: (1,) shared PReLU slope.  Wfc/bfc/att: SelfAttention params.
    """
    P_, N_, _ = a_hat.shape
    D_ = h.shape[1]
    PD = P_ * D_

    # --- lane-packed operands, built wrapper-side (plain XLA glue) ---
    # A_concat[:, p*N:(p+1)*N] = A_hat_p
    a_concat = jnp.transpose(a_hat, (1, 0, 2)).reshape(N_, P_ * N_)           # (N, P*N)
    h_blk    = jnp.kron(jnp.eye(P_, dtype=h.dtype), h)                        # (P*N, P*D)
    w_blk    = jsl.block_diag(*[W[p] for p in range(P_)])                     # (P*D, P*D)
    wfc_blk  = jnp.kron(jnp.eye(P_, dtype=Wfc.dtype), Wfc.T)                  # (P*D, P*D)

    b_row     = b.reshape(PD).astype(jnp.float32)
    bfc_row   = jnp.tile(bfc.reshape(-1), P_).astype(jnp.float32)
    att_row   = (jnp.tile(att.reshape(-1), P_) * (1.0 / N_)).astype(jnp.float32)  # fold mean's 1/N
    alpha_row = jnp.full((PD,), prelu_alpha[0], dtype=jnp.float32)

    # One packed parameter buffer -> a single prologue DMA for all small params.
    params = jnp.concatenate(
        [w_blk, wfc_blk, b_row[None], bfc_row[None], att_row[None], alpha_row[None]],
        axis=0).astype(jnp.float32)                                           # (2*PD + 4, PD)

    z_mp = pl.pallas_call(
        fused_mp_kernel,
        out_shape=jax.ShapeDtypeStruct((N_, D_), jnp.float32),
        in_specs=[
            pl.BlockSpec(memory_space=pltpu.MemorySpace.VMEM),   # A_concat   (N, P*N)
            pl.BlockSpec(memory_space=pltpu.MemorySpace.VMEM),   # h_blk      (P*N, P*D)
            pl.BlockSpec(memory_space=pltpu.MemorySpace.VMEM),   # params     (2*PD+4, PD)
        ],
        out_specs=pl.BlockSpec(memory_space=pltpu.MemorySpace.VMEM),
        compiler_params=pltpu.CompilerParams(vmem_limit_bytes=32 * 1024 * 1024),
    )(a_concat, h_blk, params)
    return z_mp


def reference_forward(a_hat, h, W, b, alpha, Wfc, bfc, att):
    embeds, logits = [], []
    for p in range(a_hat.shape[0]):
        x = (a_hat[p] @ h) @ W[p] + b[p]
        e = jnp.where(x > 0, x, alpha[0] * x)
        embeds.append(e)
        sp = jnp.tanh(e @ Wfc.T + bfc).mean(axis=0)
        logits.append(jnp.sum(att[0] * sp))
    beta = jax.nn.softmax(jnp.stack(logits))
    z = sum(beta[i] * embeds[i] for i in range(len(embeds)))
    return z


if __name__ == "__main__":
    key = jax.random.PRNGKey(0)
    k_adj, k_h, k_w, k_wfc, k_bfc, k_att = jax.random.split(key, 6)

    # synthetic meta-path reachable graphs -> dense adjacency, then 'both' normalization
    adj = (jax.random.uniform(k_adj, (P, N, N)) < 0.1).astype(jnp.float32)  # adj[p, v, u] = edge u->v
    in_deg = jnp.maximum(adj.sum(axis=2), 1.0)    # (P, N) incoming degree of v
    out_deg = jnp.maximum(adj.sum(axis=1), 1.0)   # (P, N) outgoing degree of u
    a_hat = (in_deg[:, :, None] ** -0.5) * adj * (out_deg[:, None, :] ** -0.5)

    h = jax.random.normal(k_h, (N, D), dtype=jnp.float32)

    # GraphConv params: weight (in, out) xavier-uniform-ish, bias zeros
    limit = np.sqrt(6.0 / (D + D))
    W = jax.random.uniform(k_w, (P, D, D), minval=-limit, maxval=limit, dtype=jnp.float32)
    b = jnp.zeros((P, D), dtype=jnp.float32)
    prelu_alpha = jnp.array([0.25], dtype=jnp.float32)   # nn.PReLU() default

    # SelfAttention params (xavier_normal, gain=1.414)
    std = 1.414 * np.sqrt(2.0 / (D + D))
    Wfc = std * jax.random.normal(k_wfc, (D, D), dtype=jnp.float32)
    bfc = 0.01 * jax.random.normal(k_bfc, (D,), dtype=jnp.float32)
    att_std = 1.414 * np.sqrt(2.0 / (1 + D))
    att = att_std * jax.random.normal(k_att, (1, D), dtype=jnp.float32)

    z = mp_encoder_forward(a_hat, h, W, b, prelu_alpha, Wfc, bfc, att)
    z = jax.block_until_ready(z)

    z_ref = reference_forward(a_hat, h, W, b, prelu_alpha, Wfc, bfc, att)
    np.testing.assert_allclose(np.asarray(z), np.asarray(z_ref), rtol=1e-4, atol=1e-4)

    print("KERNEL_OK")
</pallas_src>

<mosaic_0001>
module attributes {stable_mosaic.version = 11 : i64} {
  func.func @fused_mp_kernel(%arg0: memref<64x192xf32, #tpu.memory_space<vmem>>, %arg1: memref<192x96xf32, #tpu.memory_space<vmem>>, %arg2: memref<196x96xf32, #tpu.memory_space<vmem>>, %arg3: memref<64x32xf32, #tpu.memory_space<vmem>>) attributes {dimension_semantics = [], scalar_prefetch = 0 : i64, scratch_operands = 0 : i64, tpu.core_type = #tpu.core_type<tc>} {
    %c0 = arith.constant 0 : index
    %c0_0 = arith.constant 0 : index
    %0 = vector.load %arg2[%c0, %c0_0] : memref<196x96xf32, #tpu.memory_space<vmem>>, vector<96x96xf32>
    %c96 = arith.constant 96 : index
    %c0_1 = arith.constant 0 : index
    %1 = vector.load %arg2[%c96, %c0_1] : memref<196x96xf32, #tpu.memory_space<vmem>>, vector<96x96xf32>
    %c192 = arith.constant 192 : index
    %c0_2 = arith.constant 0 : index
    %2 = vector.load %arg2[%c192, %c0_2] : memref<196x96xf32, #tpu.memory_space<vmem>>, vector<4x96xf32>
    %3 = vector.extract_strided_slice %2 {offsets = [0, 0], sizes = [1, 96], strides = [1, 1]} : vector<4x96xf32> to vector<1x96xf32>
    %4 = vector.extract_strided_slice %2 {offsets = [1, 0], sizes = [1, 96], strides = [1, 1]} : vector<4x96xf32> to vector<1x96xf32>
    %5 = vector.extract_strided_slice %2 {offsets = [2, 0], sizes = [1, 96], strides = [1, 1]} : vector<4x96xf32> to vector<1x96xf32>
    %6 = vector.extract_strided_slice %2 {offsets = [3, 0], sizes = [1, 96], strides = [1, 1]} : vector<4x96xf32> to vector<1x96xf32>
    %c0_3 = arith.constant 0 : index
    %c0_4 = arith.constant 0 : index
    %7 = vector.load %arg0[%c0_3, %c0_4] : memref<64x192xf32, #tpu.memory_space<vmem>>, vector<64x192xf32>
    %c0_5 = arith.constant 0 : index
    %c0_6 = arith.constant 0 : index
    %8 = vector.load %arg1[%c0_5, %c0_6] : memref<192x96xf32, #tpu.memory_space<vmem>>, vector<192x96xf32>
    %cst = arith.constant dense<0.000000e+00> : vector<64x96xf32>
    %9 = tpu.matmul %7, %8, %cst {dimension_numbers = #tpu.dot_dimension_numbers<[1], [0], [0], [1], [0, 0, 1, 1], [], []>} : vector<64x192xf32>, vector<192x96xf32>, vector<64x96xf32> -> vector<64x96xf32>
    %cst_7 = arith.constant dense<0.000000e+00> : vector<64x96xf32>
    %10 = tpu.matmul %9, %0, %cst_7 {dimension_numbers = #tpu.dot_dimension_numbers<[1], [0], [0], [1], [0, 0, 1, 1], [], []>} : vector<64x96xf32>, vector<96x96xf32>, vector<64x96xf32> -> vector<64x96xf32>
    %11 = vector.broadcast %3 : vector<1x96xf32> to vector<64x96xf32>
    %12 = arith.addf %10, %11 : vector<64x96xf32>
    %cst_8 = arith.constant 0.000000e+00 : f32
    %13 = vector.broadcast %cst_8 : f32 to vector<64x96xf32>
    %14 = arith.cmpf ogt, %12, %13 : vector<64x96xf32>
    %15 = vector.broadcast %6 : vector<1x96xf32> to vector<64x96xf32>
    %16 = arith.mulf %15, %12 : vector<64x96xf32>
    %17 = arith.select %14, %12, %16 : vector<64x96xi1>, vector<64x96xf32>
    %cst_9 = arith.constant dense<0.000000e+00> : vector<64x96xf32>
    %18 = tpu.matmul %17, %1, %cst_9 {dimension_numbers = #tpu.dot_dimension_numbers<[1], [0], [0], [1], [0, 0, 1, 1], [], []>} : vector<64x96xf32>, vector<96x96xf32>, vector<64x96xf32> -> vector<64x96xf32>
    %19 = vector.broadcast %4 : vector<1x96xf32> to vector<64x96xf32>
    %20 = arith.addf %18, %19 : vector<64x96xf32>
    %21 = math.tanh %20 : vector<64x96xf32>
    %cst_10 = arith.constant dense<0.000000e+00> : vector<96xf32>
    %22 = vector.multi_reduction <add>, %21, %cst_10 [0] : vector<64x96xf32> to vector<96xf32>
    %23 = vector.shape_cast %22 : vector<96xf32> to vector<1x96xf32>
    %24 = arith.mulf %5, %23 : vector<1x96xf32>
    %25 = vector.extract_strided_slice %24 {offsets = [0, 0], sizes = [1, 32], strides = [1, 1]} : vector<1x96xf32> to vector<1x32xf32>
    %26 = vector.shape_cast %25 : vector<1x32xf32> to vector<1x1x32xf32>
    %cst_11 = arith.constant dense<0.000000e+00> : vector<1xf32>
    %27 = vector.multi_reduction <add>, %26, %cst_11 [1, 2] : vector<1x1x32xf32> to vector<1xf32>
    %28 = vector.shape_cast %27 : vector<1xf32> to vector<1x1x1xf32>
    %29 = vector.extract %28[0, 0, 0] : f32 from vector<1x1x1xf32>
    %30 = vector.broadcast %29 : f32 to vector<1x1xf32>
    %31 = vector.extract_strided_slice %24 {offsets = [0, 32], sizes = [1, 32], strides = [1, 1]} : vector<1x96xf32> to vector<1x32xf32>
    %32 = vector.shape_cast %31 : vector<1x32xf32> to vector<1x1x32xf32>
    %cst_12 = arith.constant dense<0.000000e+00> : vector<1xf32>
    %33 = vector.multi_reduction <add>, %32, %cst_12 [1, 2] : vector<1x1x32xf32> to vector<1xf32>
    %34 = vector.shape_cast %33 : vector<1xf32> to vector<1x1x1xf32>
    %35 = vector.extract %34[0, 0, 0] : f32 from vector<1x1x1xf32>
    %36 = vector.broadcast %35 : f32 to vector<1x1xf32>
    %37 = vector.extract_strided_slice %24 {offsets = [0, 64], sizes = [1, 32], strides = [1, 1]} : vector<1x96xf32> to vector<1x32xf32>
    %38 = vector.shape_cast %37 : vector<1x32xf32> to vector<1x1x32xf32>
    %cst_13 = arith.constant dense<0.000000e+00> : vector<1xf32>
    %39 = vector.multi_reduction <add>, %38, %cst_13 [1, 2] : vector<1x1x32xf32> to vector<1xf32>
    %40 = vector.shape_cast %39 : vector<1xf32> to vector<1x1x1xf32>
    %41 = vector.extract %40[0, 0, 0] : f32 from vector<1x1x1xf32>
    %42 = vector.broadcast %41 : f32 to vector<1x1xf32>
    %43 = arith.maximumf %30, %36 : vector<1x1xf32>
    %44 = arith.maximumf %43, %42 : vector<1x1xf32>
    %45 = arith.subf %30, %44 : vector<1x1xf32>
    %46 = math.exp %45 : vector<1x1xf32>
    %47 = arith.subf %36, %44 : vector<1x1xf32>
    %48 = math.exp %47 : vector<1x1xf32>
    %49 = arith.subf %42, %44 : vector<1x1xf32>
    %50 = math.exp %49 : vector<1x1xf32>
    %51 = arith.addf %46, %48 : vector<1x1xf32>
    %52 = arith.addf %51, %50 : vector<1x1xf32>
    %53 = tpu.reciprocal %52 : vector<1x1xf32> -> vector<1x1xf32>
    %54 = vector.extract_strided_slice %17 {offsets = [0, 0], sizes = [64, 32], strides = [1, 1]} : vector<64x96xf32> to vector<64x32xf32>
    %55 = vector.broadcast %46 : vector<1x1xf32> to vector<64x32xf32>
    %56 = arith.mulf %55, %54 : vector<64x32xf32>
    %57 = vector.extract_strided_slice %17 {offsets = [0, 32], sizes = [64, 32], strides = [1, 1]} : vector<64x96xf32> to vector<64x32xf32>
    %58 = vector.broadcast %48 : vector<1x1xf32> to vector<64x32xf32>
    %59 = arith.mulf %58, %57 : vector<64x32xf32>
    %60 = arith.addf %56, %59 : vector<64x32xf32>
    %61 = vector.extract_strided_slice %17 {offsets = [0, 64], sizes = [64, 32], strides = [1, 1]} : vector<64x96xf32> to vector<64x32xf32>
    %62 = vector.broadcast %50 : vector<1x1xf32> to vector<64x32xf32>
    %63 = arith.mulf %62, %61 : vector<64x32xf32>
    %64 = arith.addf %60, %63 : vector<64x32xf32>
    %65 = vector.broadcast %53 : vector<1x1xf32> to vector<64x32xf32>
    %66 = arith.mulf %64, %65 : vector<64x32xf32>
    %c0_14 = arith.constant 0 : index
    %c0_15 = arith.constant 0 : index
    %67 = vector.load %arg3[%c0_14, %c0_15] : memref<64x32xf32, #tpu.memory_space<vmem>>, vector<64x32xf32>
    tpu.vector_store %arg3[%c0_14, %c0_15], %66 {strides = array<i32>} : memref<64x32xf32, #tpu.memory_space<vmem>>, vector<64x32xf32>,
    return
  }
}

</mosaic_0001>

<bundles_post_ra>
// kernel: tpu_custom_call.1
= control target key start
LH: loop header
LB: loop body
LE: loop exit
PB: predicated region body
PF: predicated region fallthrough
CT: control target
= control target key end

     0   :  { %v969_v0 = vmov 0.0|0.0   ;;  %vm79_vm0 = vcmask 523264   ;;  %vm213_vm1 = vcmask 785408   ;;  %vm537_vm10 = vcmask 253952   ;;  %s971_s4 = smov 64   ;;  %s1346_s1 = inlined_call_operand.vmem [shape: f32[192,96], index: 1, kind: input, shape index: {}]   ;;  %s1347_s0 = inlined_call_operand.vmem [shape: f32[64,192], index: 0, kind: input, shape index: {}]   ;;  %s1348_s2 = inlined_call_operand.vmem [shape: f32[196,96], index: 2, kind: input, shape index: {}]   ;;  %s1349_s3 = inlined_call_operand.vmem [shape: f32[64,32], index: 3, kind: output, shape index: {}]  }
   0x1   :  { %852 = vmatprep.subr.bf16.mxu0 %v969_v0  ;;  %v55_v1 = vld [vmem:[%s1346_s1] sm:$0xff]  ;;  %v56_v2 = vld [vmem:[%s1346_s1 + $0x8] sm:$0xff]  ;;  %v57_v3 = vld [vmem:[%s1346_s1 + $0x10] sm:$0xff]  ;;  %vm703_vm11 = vcmask 261120  }
   0x2   :  { %v853_v4 = vpack.c.bf16 %v56_v2, %v55_v1  ;;  %v58_v5 = vld [vmem:[%s1346_s1 + $0x18] sm:$0xff]  ;;  %v59_v7 = vld [vmem:[%s1346_s1 + $0x20] sm:$0xff]  ;;  %v60_v8 = vld [vmem:[%s1346_s1 + $0x28] sm:$0xff] }
   0x3   :  { %v856_v6 = vpack.c.bf16 %v58_v5, %v57_v3  ;;  %v859_v9 = vpack.c.bf16 %v60_v8, %v59_v7  ;;  %v61_v10 = vld [vmem:[%s1346_s1 + $0x30] sm:$0xff]  ;;  %v62_v11 = vld [vmem:[%s1346_s1 + $0x38] sm:$0xff]  ;;  %v40_v12 = vld [vmem:[%s1347_s0 + $0x8] sm:$0xff] }
   0x4   :  { %854 = vmatpush1.bf16.msra.mxu0 %v853_v4  ;;  %716 = vmatprep.mubr.msk.f32.mxu0 %vm79_vm0, %v40_v12  ;;  %v862_v13 = vpack.c.bf16 %v62_v11, %v61_v10  ;;  %v63_v14 = vld [vmem:[%s1346_s1 + $0x40] sm:$0xff]  ;;  %v64_v15 = vld [vmem:[%s1346_s1 + $0x48] sm:$0xff]  ;;  %v16_v19 = vld [vmem:[%s1348_s2 + $0x10] sm:$0xff] }
   0x5   :  { %855 = vmatprep.subr.bf16.mxu0 %v969_v0  ;;  %v14_v16 = vld [vmem:[%s1348_s2] sm:$0xff]  ;;  %v15_v17 = vld [vmem:[%s1348_s2 + $0x8] sm:$0xff]  ;;  %v17_v20 = vld [vmem:[%s1348_s2 + $0x18] sm:$0xff]  ;;  %v865_v21 = vpack.c.bf16 %v64_v15, %v63_v14 }
   0x6   :  { %v888_v18 = vpack.c.bf16 %v15_v17, %v14_v16  ;;  %v892_v22 = vpack.c.bf16 %v17_v20, %v16_v19  ;;  %v18_v23 = vld [vmem:[%s1348_s2 + $0x20] sm:$0xff]  ;;  %v19_v24 = vld [vmem:[%s1348_s2 + $0x28] sm:$0xff]  ;;  %v65_v25 = vld [vmem:[%s1346_s1 + $0x50] sm:$0xff] }
   0x7   :  { %v66_v26 = vld [vmem:[%s1346_s1 + $0x58] sm:$0xff]  ;;  %v896_v27 = vpack.c.bf16 %v19_v24, %v18_v23  ;;  %v20_v29 = vld [vmem:[%s1348_s2 + $0x30] sm:$0xff]  ;;  %v67_v31 = vld [vmem:[%s1346_s1 + $0x60] sm:$0xff] }
   0x8   :  { %857 = vmatpush1.bf16.msra.mxu0 %v856_v6  ;;  %889 = vmatprep.subr.bf16.mxu1 %v888_v18  ;;  %v868_v28 = vpack.c.bf16 %v66_v26, %v65_v25  ;;  %v21_v30 = vld [vmem:[%s1348_s2 + $0x38] sm:$0xff]  ;;  %v68_v32 = vld [vmem:[%s1346_s1 + $0x68] sm:$0xff]  ;;  %v22_v35 = vld [vmem:[%s1348_s2 + $0x40] sm:$0xff] }
   0x9   :  { %858 = vmatprep.subr.bf16.mxu0 %v969_v0  ;;  %891 = vmatpush3.bf16.msra.mxu1 %v888_v18  ;;  %v900_v33 = vpack.c.bf16 %v21_v30, %v20_v29  ;;  %v871_v34 = vpack.c.bf16 %v68_v32, %v67_v31  ;;  %v23_v36 = vld [vmem:[%s1348_s2 + $0x48] sm:$0xff]  ;;  %v69_v37 = vld [vmem:[%s1346_s1 + $0x70] sm:$0xff]  ;;  %v70_v38 = vld [vmem:[%s1346_s1 + $0x78] sm:$0xff] }
   0xa   :  { %893 = vmatprep.subr.bf16.mxu1 %v892_v22  ;;  %v904_v39 = vpack.c.bf16 %v23_v36, %v22_v35  ;;  %v874_v40 = vpack.c.bf16 %v70_v38, %v69_v37  ;;  %v71_v41 = vld [vmem:[%s1346_s1 + $0x80] sm:$0xff]  ;;  %v72_v42 = vld [vmem:[%s1346_s1 + $0x88] sm:$0xff]  ;;  %v73_v44 = vld [vmem:[%s1346_s1 + $0x90] sm:$0xff] }
   0xb   :  { %v877_v43 = vpack.c.bf16 %v72_v42, %v71_v41  ;;  %v74_v45 = vld [vmem:[%s1346_s1 + $0x98] sm:$0xff]  ;;  %v75_v47 = vld [vmem:[%s1346_s1 + $0xa0] sm:$0xff]  ;;  %v76_v48 = vld [vmem:[%s1346_s1 + $0xa8] sm:$0xff]  ;;  %v209_v41 = vlaneseq }
   0xc   :  { %860 = vmatpush1.bf16.msra.mxu0 %v859_v9  ;;  %v880_v46 = vpack.c.bf16 %v74_v45, %v73_v44  ;;  %v883_v49 = vpack.c.bf16 %v76_v48, %v75_v47  ;;  %v77_v50 = vld [vmem:[%s1346_s1 + $0xb0] sm:$0xff]  ;;  %v78_v51 = vld [vmem:[%s1346_s1 + $0xb8] sm:$0xff]  ;;  %v39_v53 = vld [vmem:[%s1347_s0] sm:$0xff] }
   0xd   :  { %861 = vmatprep.subr.bf16.mxu0 %v969_v0  ;;  %895 = vmatpush3.bf16.msra.mxu1 %v892_v22  ;;  %v886_v52 = vpack.c.bf16 %v78_v51, %v77_v50  ;;  %v42_v54 = vld [vmem:[%s1347_s0 + $0x18] sm:$0xff]  ;;  %v41_v55 = vld [vmem:[%s1347_s0 + $0x10] sm:$0xff]  ;;  %v44_v56 = vld [vmem:[%s1347_s0 + $0x28] sm:$0xff]  ;;  %v210_v42 = vshrl.u32 %v209_v41, 7 }
   0xe   :  { %897 = vmatprep.subr.bf16.mxu1 %v896_v27  ;;  %v43_v57 = vld [vmem:[%s1347_s0 + $0x20] sm:$0xff]  ;;  %v46_v58 = vld [vmem:[%s1347_s0 + $0x38] sm:$0xff]  ;;  %v45_v59 = vld [vmem:[%s1347_s0 + $0x30] sm:$0xff] }
   0xf   :  { %v48_v60 = vld [vmem:[%s1347_s0 + $0x48] sm:$0xff]  ;;  %v47_v61 = vld [vmem:[%s1347_s0 + $0x40] sm:$0xff]  ;;  %v50_v62 = vld [vmem:[%s1347_s0 + $0x58] sm:$0xff]  ;;  %v353_v45 = vsub.s32 3, %v210_v42 }
  0x10   :  { %863 = vmatpush1.bf16.msra.mxu0 %v862_v13  ;;  %v49_v63 = vld [vmem:[%s1347_s0 + $0x50] sm:$0xff]  ;;  %v51_v1 = vld [vmem:[%s1347_s0 + $0x60] sm:$0xff]  ;;  %v54_v2 = vld [vmem:[%s1347_s0 + $0x78] sm:$0xff] }
  0x11   :  { %864 = vmatprep.subr.bf16.mxu0 %v969_v0  ;;  %899 = vmatpush3.bf16.msra.mxu1 %v896_v27  ;;  %v53_v3 = vld [vmem:[%s1347_s0 + $0x70] sm:$0xff]  ;;  %v25_v5 = vld [vmem:[%s1348_s2 + $0x58] sm:$0xff]  ;;  %v26_v7 = vld [vmem:[%s1348_s2 + $0x60] sm:$0xff] }
  0x12   :  { %901 = vmatprep.subr.bf16.mxu1 %v900_v33  ;;  %v24_v4 = vld [vmem:[%s1348_s2 + $0x50] sm:$0xff]  ;;  %v27_v8 = vld [vmem:[%s1348_s2 + $0x68] sm:$0xff]  ;;  %v29_v12 = vld [vmem:[%s1348_s2 + $0x78] sm:$0xff] }
  0x13   :  { %v908_v6 = vpack.c.bf16 %v25_v5, %v24_v4  ;;  %v912_v9 = vpack.c.bf16 %v27_v8, %v26_v7  ;;  %v28_v11 = vld [vmem:[%s1348_s2 + $0x70] sm:$0xff]  ;;  %v30_v16 = vld [vmem:[%s1348_s2 + $0x80] sm:$0xff]  ;;  %v31_v17 = vld [vmem:[%s1348_s2 + $0x88] sm:$0xff] }
  0x14   :  { %866 = vmatpush1.bf16.msra.mxu0 %v865_v21  ;;  %v916_v14 = vpack.c.bf16 %v29_v12, %v28_v11  ;;  %v920_v19 = vpack.c.bf16 %v31_v17, %v30_v16  ;;  %v32_v21 = vld [vmem:[%s1348_s2 + $0x90] sm:$0xff]  ;;  %v33_v22 = vld [vmem:[%s1348_s2 + $0x98] sm:$0xff]  ;;  %v34_v35 = vld [vmem:[%s1348_s2 + $0xa0] sm:$0xff]  ;;  %v373_v16 = vsub.s32 1, %v210_v42 }
  0x15   :  { %867 = vmatprep.subr.bf16.mxu0 %v969_v0  ;;  %903 = vmatpush3.bf16.msra.mxu1 %v900_v33  ;;  %v924_v24 = vpack.c.bf16 %v33_v22, %v32_v21  ;;  %v35_v36 = vld [vmem:[%s1348_s2 + $0xa8] sm:$0xff]  ;;  %v36_v38 = vld [vmem:[%s1348_s2 + $0xb0] sm:$0xff]  ;;  %v1215_v44 = vld [vmem:[%s1348_s2 + $0xc0] sm:$0xf] }
  0x16   :  { %905 = vmatprep.subr.bf16.mxu1 %v904_v39  ;;  %v928_v37 = vpack.c.bf16 %v35_v36, %v34_v35  ;;  %v354_v47 = vrot.slane %v1215_v44, %v353_v45  ;;  %v374_v17 = vrot.slane %v1215_v44, %v373_v16 }
  0x18   :  { %869 = vmatpush1.bf16.msra.mxu0 %v868_v28 }
  0x19   :  { %870 = vmatprep.subr.bf16.mxu0 %v969_v0  ;;  %907 = vmatpush3.bf16.msra.mxu1 %v904_v39  ;;  %v37_v39 = vld [vmem:[%s1348_s2 + $0xb8] sm:$0xff]  ;;  %s970_s2 = smov 96  }
  0x1a   :  { %909 = vmatprep.subr.bf16.mxu1 %v908_v6 }
  0x1c   :  { %872 = vmatpush1.bf16.msra.mxu0 %v871_v34 }
  0x1d   :  { %873 = vmatprep.subr.bf16.mxu0 %v969_v0  ;;  %911 = vmatpush3.bf16.msra.mxu1 %v908_v6 }
  0x1e   :  { %913 = vmatprep.subr.bf16.mxu1 %v912_v9 }
  0x20   :  { %875 = vmatpush1.bf16.msra.mxu0 %v874_v40  ;;  %v932_v40 = vpack.c.bf16 %v37_v39, %v36_v38 }
  0x21   :  { %876 = vmatprep.subr.bf16.mxu0 %v969_v0 }
  0x24   :  { %878 = vmatpush1.bf16.msra.mxu0 %v877_v43  ;;  %v211_v43 = vsub.s32 0, %v210_v42 }
  0x25   :  { %879 = vmatprep.subr.bf16.mxu0 %v969_v0 }
  0x28   :  { %881 = vmatpush1.bf16.msra.mxu0 %v880_v46  ;;  %v212_v46 = vrot.slane %v1215_v44, %v211_v43 }
  0x29   :  { %882 = vmatprep.subr.bf16.mxu0 %v969_v0 }
  0x2c   :  { %884 = vmatpush1.bf16.msra.mxu0 %v883_v49 }
  0x2d   :  { %885 = vmatprep.subr.bf16.mxu0 %v969_v0  ;;  %v52_v0 = vld [vmem:[%s1347_s0 + $0x68] sm:$0xff] }
  0x30   :  { %887 = vmatpush1.bf16.msra.mxu0 %v886_v52 }
  0x33   :  { %169 = vmatmul.mubr.f32.vlgmr.msra.gmra.mrb[0].mxu0 %v39_v53 }
  0x34   :  { %717 = vmatprep.mubr.msk.f32.mxu0 %vm79_vm0, %v42_v54 }
  0x37   :  { %174 = vmatmul.mubr.f32.gmra.mrb[2].mxu0 %v41_v55 }
  0x38   :  { %718 = vmatprep.mubr.msk.f32.mxu0 %vm79_vm0, %v44_v56 }
  0x3b   :  { %179 = vmatmul.mubr.f32.gmra.mrb[4].mxu0 %v43_v57 }
  0x3c   :  { %719 = vmatprep.mubr.msk.f32.mxu0 %vm79_vm0, %v46_v58 }
  0x3f   :  { %184 = vmatmul.mubr.f32.gmra.mrb[6].mxu0 %v45_v59 }
  0x40   :  { %720 = vmatprep.mubr.msk.f32.mxu0 %vm79_vm0, %v48_v60 }
  0x43   :  { %189 = vmatmul.mubr.f32.gmra.mrb[8].mxu0 %v47_v61 }
  0x44   :  { %721 = vmatprep.mubr.msk.f32.mxu0 %vm79_vm0, %v50_v62 }
  0x47   :  { %194 = vmatmul.mubr.f32.gmra.mrb[10].mxu0 %v49_v63 }
  0x48   :  { %722 = vmatprep.mubr.msk.f32.mxu0 %vm79_vm0, %v52_v0 }
  0x4b   :  { %199 = vmatmul.mubr.f32.gmra.mrb[12].mxu0 %v51_v1 }
  0x4c   :  { %723 = vmatprep.mubr.msk.f32.mxu0 %vm79_vm0, %v54_v2 }
  0x4f   :  { %204 = vmatmul.mubr.f32.gmra.mrb[14].mxu0 %v53_v3 }
 0x106   :  { %v170_v10 = vpop.f32.mrb[0].mxu0 }
 0x107   :  { %v172_v13 = vpop.f32.mrb[1].mxu0  ;;  %804 = vmatprep.mubr.msk.f32.mxu1 %vm213_vm1, %v170_v10 }
 0x10a   :  { %v175_v15 = vpop.f32.mrb[2].mxu0 }
 0x10b   :  { %v177_v18 = vpop.f32.mrb[3].mxu0  ;;  %805 = vmatmul.mubr.msk.f32.vlgmr.msra.gmra.mrb[0].mxu1 %vm213_vm1, %v175_v15 }
 0x10c   :  { %915 = vmatpush3.bf16.msra.mxu1 %v912_v9 }
 0x10d   :  { %917 = vmatprep.subr.bf16.mxu1 %v916_v14 }
 0x10e   :  { %v180_v20 = vpop.f32.mrb[4].mxu0 }
 0x10f   :  { %v182_v23 = vpop.f32.mrb[5].mxu0  ;;  %807 = vmatprep.mubr.msk.f32.mxu1 %vm213_vm1, %v180_v20 }
 0x110   :  { %919 = vmatpush3.bf16.msra.mxu1 %v916_v14 }
 0x111   :  { %921 = vmatprep.subr.bf16.mxu1 %v920_v19 }
 0x112   :  { %v185_v25 = vpop.f32.mrb[6].mxu0 }
 0x113   :  { %v187_v26 = vpop.f32.mrb[7].mxu0  ;;  %808 = vmatmul.mubr.msk.f32.gmra.mrb[2].mxu1 %vm213_vm1, %v185_v25 }
 0x114   :  { %923 = vmatpush3.bf16.msra.mxu1 %v920_v19 }
 0x115   :  { %925 = vmatprep.subr.bf16.mxu1 %v924_v24 }
 0x116   :  { %v190_v27 = vpop.f32.mrb[8].mxu0 }
 0x117   :  { %v192_v28 = vpop.f32.mrb[9].mxu0  ;;  %810 = vmatprep.mubr.msk.f32.mxu1 %vm213_vm1, %v190_v27 }
 0x118   :  { %927 = vmatpush3.bf16.msra.mxu1 %v924_v24 }
 0x119   :  { %929 = vmatprep.subr.bf16.mxu1 %v928_v37 }
 0x11a   :  { %v195_v29 = vpop.f32.mrb[10].mxu0 }
 0x11b   :  { %v197_v30 = vpop.f32.mrb[11].mxu0  ;;  %811 = vmatmul.mubr.msk.f32.gmra.mrb[4].mxu1 %vm213_vm1, %v195_v29 }
 0x11c   :  { %931 = vmatpush3.bf16.msra.mxu1 %v928_v37 }
 0x11d   :  { %933 = vmatprep.subr.bf16.mxu1 %v932_v40 }
 0x11e   :  { %v200_v31 = vpop.f32.mrb[12].mxu0 }
 0x11f   :  { %v202_v32 = vpop.f32.mrb[13].mxu0  ;;  %813 = vmatprep.mubr.msk.f32.mxu1 %vm213_vm1, %v200_v31 }
 0x120   :  { %935 = vmatpush3.bf16.msra.mxu1 %v932_v40 }
 0x122   :  { %v205_v33 = vpop.f32.mrb[14].mxu0 }
 0x123   :  { %v207_v34 = vpop.f32.mrb[15].mxu0  ;;  %814 = vmatmul.mubr.msk.f32.gmra.mrb[6].mxu1 %vm213_vm1, %v205_v33 }
 0x1de   :  { %v806_v48 = vpop.f32.mrb[0].mxu1 }
 0x1df   :  { %v310_v49 = vadd.f32 %v806_v48, %v212_v46  ;;  %v304_v50 = vpop.f32.mrb[1].mxu1 }
 0x1e0   :  { %v305_v51 = vadd.f32 %v304_v50, %v212_v46 }
 0x1e1   :  { %v356_v52 = vmul.f32 %v354_v47, %v310_v49  ;;  %vm344_vm2 = vcmp.gt.f32.partialorder %v310_v49, 0.0 }
 0x1e2   :  { %vm343_vm3 = vcmp.gt.f32.partialorder %v305_v51, 0.0  ;;  %v355_v53 = vmul.f32 %v354_v47, %v305_v51 }
 0x1e3   :  { %v1221_v55 = vsel %vm344_vm2, %v310_v49, %v356_v52 }
 0x1e4   :  { %v1219_v54 = vsel %vm343_vm3, %v305_v51, %v355_v53 }
 0x1e5   :  { %840 = vmatprep.mubr.msk.f32.mxu1 %vm213_vm1, %v1219_v54 }
 0x1e6   :  { %v809_v56 = vpop.f32.mrb[2].mxu1  ;;  %841 = vmatmul.mubr.msk.f32.vlgmr.msra.gmra.mrb[8].mxu1 %vm213_vm1, %v1221_v55 }
 0x1e7   :  { %v320_v57 = vadd.f32 %v809_v56, %v212_v46  ;;  %v314_v58 = vpop.f32.mrb[3].mxu1 }
 0x1e8   :  { %v315_v59 = vadd.f32 %v314_v58, %v212_v46 }
 0x1e9   :  { %v358_v60 = vmul.f32 %v354_v47, %v320_v57  ;;  %vm346_vm4 = vcmp.gt.f32.partialorder %v320_v57, 0.0 }
 0x1ea   :  { %vm345_vm5 = vcmp.gt.f32.partialorder %v315_v59, 0.0  ;;  %v357_v61 = vmul.f32 %v354_v47, %v315_v59 }
 0x1eb   :  { %v1231_v63 = vsel %vm346_vm4, %v320_v57, %v358_v60 }
 0x1ec   :  { %v1227_v62 = vsel %vm345_vm5, %v315_v59, %v357_v61 }
 0x1ed   :  { %843 = vmatprep.mubr.msk.f32.mxu1 %vm213_vm1, %v1227_v62 }
 0x1ee   :  { %v812_v0 = vpop.f32.mrb[4].mxu1  ;;  %844 = vmatmul.mubr.msk.f32.gmra.mrb[10].mxu1 %vm213_vm1, %v1231_v63 }
 0x1ef   :  { %v330_v1 = vadd.f32 %v812_v0, %v212_v46  ;;  %v324_v2 = vpop.f32.mrb[5].mxu1 }
 0x1f0   :  { %v325_v3 = vadd.f32 %v324_v2, %v212_v46 }
 0x1f1   :  { %v360_v4 = vmul.f32 %v354_v47, %v330_v1  ;;  %vm348_vm6 = vcmp.gt.f32.partialorder %v330_v1, 0.0 }
 0x1f2   :  { %vm347_vm7 = vcmp.gt.f32.partialorder %v325_v3, 0.0  ;;  %v359_v5 = vmul.f32 %v354_v47, %v325_v3 }
 0x1f3   :  { %v1239_v7 = vsel %vm348_vm6, %v330_v1, %v360_v4 }
 0x1f4   :  { %v1235_v6 = vsel %vm347_vm7, %v325_v3, %v359_v5 }
 0x1f5   :  { %846 = vmatprep.mubr.msk.f32.mxu1 %vm213_vm1, %v1235_v6 }
 0x1f6   :  { %v815_v8 = vpop.f32.mrb[6].mxu1  ;;  %847 = vmatmul.mubr.msk.f32.gmra.mrb[12].mxu1 %vm213_vm1, %v1239_v7 }
 0x1f7   :  { %v340_v9 = vadd.f32 %v815_v8, %v212_v46  ;;  %v334_v10 = vpop.f32.mrb[7].mxu1 }
 0x1f8   :  { %v335_v11 = vadd.f32 %v334_v10, %v212_v46 }
 0x1f9   :  { %v362_v12 = vmul.f32 %v354_v47, %v340_v9  ;;  %vm350_vm8 = vcmp.gt.f32.partialorder %v340_v9, 0.0 }
 0x1fa   :  { %vm349_vm9 = vcmp.gt.f32.partialorder %v335_v11, 0.0  ;;  %v361_v13 = vmul.f32 %v354_v47, %v335_v11 }
 0x1fb   :  { %v1247_v15 = vsel %vm350_vm8, %v340_v9, %v362_v12 }
 0x1fc   :  { %v1243_v14 = vsel %vm349_vm9, %v335_v11, %v361_v13 }
 0x1fd   :  { %849 = vmatprep.mubr.msk.f32.mxu1 %vm213_vm1, %v1243_v14 }
 0x1fe   :  { %850 = vmatmul.mubr.msk.f32.gmra.mrb[14].mxu1 %vm213_vm1, %v1247_v15 }
 0x2b9   :  { %v842_v18 = vpop.f32.mrb[8].mxu1 }
 0x2ba   :  { %v471_v19 = vadd.f32 %v842_v18, %v374_v17  ;;  %v465_v20 = vpop.f32.mrb[9].mxu1 }
 0x2bb   :  { %v466_v21 = vadd.f32 %v465_v20, %v374_v17 }
 0x2bc   :  { %945 = vtanh.f32 %v471_v19 }
 0x2bd   :  { %947 = vtanh.f32 %v466_v21 }
 0x2c1   :  { %v845_v22 = vpop.f32.mrb[10].mxu1 }
 0x2c2   :  { %v481_v23 = vadd.f32 %v845_v22, %v374_v17  ;;  %v475_v24 = vpop.f32.mrb[11].mxu1 }
 0x2c3   :  { %v476_v25 = vadd.f32 %v475_v24, %v374_v17 }
 0x2c4   :  { %949 = vtanh.f32 %v481_v23 }
 0x2c5   :  { %951 = vtanh.f32 %v476_v25 }
 0x2c6   :  { %v946_v26 = vpop.eup %945 }
 0x2c7   :  { %v948_v27 = vpop.eup %947  ;;  %v513_v28 = vsel %vm213_vm1, %v946_v26, 0.0 }
 0x2c8   :  { %v512_v29 = vsel %vm213_vm1, %v948_v27, 0.0 }
 0x2c9   :  { %v514_v30 = vadd.f32 %v513_v28, %v512_v29  ;;  %v848_v31 = vpop.f32.mrb[12].mxu1 }
 0x2ca   :  { %v491_v32 = vadd.f32 %v848_v31, %v374_v17  ;;  %v485_v33 = vpop.f32.mrb[13].mxu1 }
 0x2cb   :  { %v486_v34 = vadd.f32 %v485_v33, %v374_v17 }
 0x2cc   :  { %953 = vtanh.f32 %v491_v32 }
 0x2cd   :  { %955 = vtanh.f32 %v486_v34 }
 0x2ce   :  { %v950_v35 = vpop.eup %949 }
 0x2cf   :  { %v952_v36 = vpop.eup %951  ;;  %v517_v40 = vsel %vm213_vm1, %v950_v35, 0.0 }
 0x2d0   :  { %v515_v37 = vsel %vm213_vm1, %v952_v36, 0.0 }
 0x2d1   :  { %v516_v38 = vadd.f32 %v515_v37, %v514_v30  ;;  %v851_v39 = vpop.f32.mrb[14].mxu1 }
 0x2d2   :  { %v501_v41 = vadd.f32 %v851_v39, %v374_v17  ;;  %v495_v42 = vpop.f32.mrb[15].mxu1 }
 0x2d3   :  { %v518_v43 = vadd.f32 %v517_v40, %v516_v38  ;;  %v496_v45 = vadd.f32 %v495_v42, %v374_v17 }
 0x2d4   :  { %957 = vtanh.f32 %v501_v41 }
 0x2d5   :  { %959 = vtanh.f32 %v496_v45 }
 0x2d6   :  { %v954_v46 = vpop.eup %953 }
 0x2d7   :  { %v956_v47 = vpop.eup %955  ;;  %v521_v50 = vsel %vm213_vm1, %v954_v46, 0.0 }
 0x2d8   :  { %v519_v48 = vsel %vm213_vm1, %v956_v47, 0.0 }
 0x2d9   :  { %v520_v49 = vadd.f32 %v519_v48, %v518_v43 }
 0x2db   :  { %v522_v51 = vadd.f32 %v521_v50, %v520_v49 }
 0x2de   :  { %v958_v52 = vpop.eup %957 }
 0x2df   :  { %v960_v53 = vpop.eup %959  ;;  %v525_v58 = vsel %vm213_vm1, %v958_v52, 0.0 }
 0x2e0   :  { %v523_v56 = vsel %vm213_vm1, %v960_v53, 0.0 }
 0x2e1   :  { %v524_v57 = vadd.f32 %v523_v56, %v522_v51 }
 0x2e3   :  { %v526_v59 = vadd.f32 %v525_v58, %v524_v57 }
 0x2e5   :  { %v527_v60 = vrot.slane %v526_v59, 4 }
 0x2e7   :  { %v528_v61 = vadd.f32 %v527_v60, %v526_v59 }
 0x2e9   :  { %v529_v0 = vrot.slane %v528_v61, 2 }
 0x2eb   :  { %v530_v1 = vadd.f32 %v529_v0, %v528_v61 }
 0x2ed   :  { %v531_v2 = vrot.slane %v530_v1, 1 }
 0x2ef   :  { %v532_v3 = vadd.f32 %v531_v2, %v530_v1 }
 0x2f1   :  { %v533_v4 = vmul.f32 %v532_v3, %v1215_v44 }
 0x2f3   :  { %v535_v5 = vrot.slane %v533_v4, 2 }
 0x2f5   :  { %549 = vrot.lane.b32.xlu0 %v535_v5, %s970_s2  ;;  %v538_v8 = vsel %vm537_vm10, %v535_v5, 0.0 }
 0x2f6   :  { %539 = vadd.xlane.f32.xlu1 %v538_v8 }
 0x2f9   :  { %563 = vrot.lane.b32.xlu0 %v535_v5, %s971_s4 }
 0x367   :  { %v550_v9 = vpop.permute.xlu0 %549 }
 0x368   :  { %v552_v10 = vsel %vm537_vm10, %v550_v9, 0.0 }
 0x369   :  { %553 = vadd.xlane.f32.xlu1 %v552_v10 }
 0x36b   :  { %v564_v11 = vpop.permute.xlu0 %563 }
 0x36c   :  { %v566_v12 = vsel %vm537_vm10, %v564_v11, 0.0 }
 0x36d   :  { %567 = vadd.xlane.f32.xlu0 %v566_v12 }
 0x383   :  { %v540_v13 = vpop.xlane.xlu1 %539 }
 0x384   :  { %v541_v16 = vrot.slane %v540_v13, 4 }
 0x386   :  { %v542_v17 = vadd.f32 %v541_v16, %v540_v13 }
 0x388   :  { %v543_v44 = vrot.slane %v542_v17, 2 }
 0x38a   :  { %v544_v18 = vadd.f32 %v543_v44, %v542_v17 }
 0x38c   :  { %v545_v19 = vrot.slane %v544_v18, 1 }
 0x38e   :  { %v546_v20 = vadd.f32 %v545_v19, %v544_v18 }
 0x390   :  { %936 = vpush %v546_v20 }
 0x3c1   :  { %s937_s5 = spop %936 }
 0x3c2   :  { %v548_v36 = vstv %s937_s5 }
 0x3f6   :  { %v554_v21 = vpop.xlane.xlu1 %553 }
 0x3f7   :  { %v555_v22 = vrot.slane %v554_v21, 4 }
 0x3f9   :  { %v556_v23 = vadd.f32 %v555_v22, %v554_v21 }
 0x3fa   :  { %v568_v24 = vpop.xlane.xlu0 %567 }
 0x3fb   :  { %v557_v25 = vrot.slane %v556_v23, 2  ;;  %v569_v26 = vrot.slane %v568_v24, 4 }
 0x3fd   :  { %v570_v27 = vadd.f32 %v569_v26, %v568_v24  ;;  %v558_v28 = vadd.f32 %v557_v25, %v556_v23 }
 0x3ff   :  { %v571_v29 = vrot.slane %v570_v27, 2  ;;  %v559_v30 = vrot.slane %v558_v28, 1 }
 0x401   :  { %v560_v31 = vadd.f32 %v559_v30, %v558_v28  ;;  %v572_v32 = vadd.f32 %v571_v29, %v570_v27 }
 0x403   :  { %938 = vpush %v560_v31  ;;  %v573_v33 = vrot.slane %v572_v32, 1 }
 0x405   :  { %v574_v34 = vadd.f32 %v573_v33, %v572_v32 }
 0x407   :  { %940 = vpush %v574_v34 }
 0x434   :  { %s939_s6 = spop %938 }
 0x435   :  { %v562_v35 = vstv %s939_s6 }
 0x436   :  { %v577_v37 = vmax.f32 %v548_v36, %v562_v35 }
 0x438   :  { %s941_s1 = spop %940 }
 0x439   :  { %v576_v38 = vstv %s941_s1 }
 0x43a   :  { %v578_v39 = vmax.f32 %v577_v37, %v576_v38 }
 0x43c   :  { %v579_v40 = vsub.f32 %v548_v36, %v578_v39  ;;  %v582_v41 = vsub.f32 %v562_v35, %v578_v39  ;;  %v585_v42 = vsub.f32 %v576_v38, %v578_v39 }
 0x43e   :  { %v580_v43 = vmul.f32 1.442695, %v579_v40  ;;  %v583_v45 = vmul.f32 1.442695, %v582_v41  ;;  %v586_v46 = vmul.f32 1.442695, %v585_v42 }
 0x440   :  { %961 = vpow2.f32 %v583_v45 }
 0x441   :  { %963 = vpow2.f32 %v580_v43 }
 0x442   :  { %965 = vpow2.f32 %v586_v46 }
 0x44a   :  { %v962_v47 = vpop.eup %961 }
 0x44b   :  { %v1263_v48 = vpop.eup %963  ;;  %v604_v49 = vmul.f32 %v962_v47, %v1239_v7  ;;  %v599_v50 = vmul.f32 %v962_v47, %v1219_v54  ;;  %v600_v53 = vmul.f32 %v962_v47, %v1221_v55  ;;  %v601_v59 = vmul.f32 %v962_v47, %v1227_v62 }
 0x44c   :  { %v966_v51 = vpop.eup %965  ;;  %v588_v56 = vadd.f32 %v1263_v48, %v962_v47  ;;  %v602_v61 = vmul.f32 %v962_v47, %v1231_v63  ;;  %v603_v0 = vmul.f32 %v962_v47, %v1235_v6  ;;  %v605_v1 = vmul.f32 %v962_v47, %v1243_v14 }
 0x44d   :  { %625 = vrot.lane.b32.xlu0 %v604_v49, %s970_s2  ;;  %615 = vrot.lane.b32.xlu1 %v599_v50, %s970_s2  ;;  %v650_v52 = vmul.f32 %v966_v51, %v1231_v63  ;;  %v652_v58 = vmul.f32 %v966_v51, %v1239_v7  ;;  %v654_v60 = vmul.f32 %v966_v51, %v1247_v15 }
 0x44e   :  { %v589_v57 = vadd.f32 %v966_v51, %v588_v56  ;;  %v606_v2 = vmul.f32 %v962_v47, %v1247_v15  ;;  %v647_v3 = vmul.f32 %v966_v51, %v1219_v54  ;;  %v648_v4 = vmul.f32 %v966_v51, %v1221_v55 }
 0x44f   :  { %v649_v5 = vmul.f32 %v966_v51, %v1227_v62  ;;  %v651_v8 = vmul.f32 %v966_v51, %v1235_v6  ;;  %v653_v9 = vmul.f32 %v966_v51, %v1243_v14  ;;  %v596_v16 = vmul.f32 %v1263_v48, %v1239_v7 }
 0x450   :  { %967 = vrcp.f32 %v589_v57  ;;  %v594_v22 = vmul.f32 %v1263_v48, %v1231_v63  ;;  %v598_v28 = vmul.f32 %v1263_v48, %v1247_v15  ;;  %v591_v29 = vmul.f32 %v1263_v48, %v1219_v54 }
 0x451   :  { %669 = vrot.lane.b32.xlu0 %v650_v52, %s971_s4  ;;  %617 = vrot.lane.b32.xlu1 %v600_v53, %s970_s2  ;;  %v592_v35 = vmul.f32 %v1263_v48, %v1221_v55  ;;  %v593_v54 = vmul.f32 %v1263_v48, %v1227_v62  ;;  %v595_v43 = vmul.f32 %v1263_v48, %v1235_v6 }
 0x452   :  { %v597_v49 = vmul.f32 %v1263_v48, %v1243_v14 }
 0x455   :  { %673 = vrot.lane.b32.xlu0 %v652_v58, %s971_s4  ;;  %619 = vrot.lane.b32.xlu1 %v601_v59, %s970_s2 }
 0x459   :  { %677 = vrot.lane.b32.xlu0 %v654_v60, %s971_s4  ;;  %621 = vrot.lane.b32.xlu1 %v602_v61, %s970_s2 }
 0x45a   :  { %v968_v20 = vpop.eup %967 }
 0x45d   :  { %623 = vrot.lane.b32.xlu1 %v603_v0, %s970_s2 }
 0x461   :  { %627 = vrot.lane.b32.xlu1 %v605_v1, %s970_s2 }
 0x465   :  { %629 = vrot.lane.b32.xlu1 %v606_v2, %s970_s2 }
 0x469   :  { %663 = vrot.lane.b32.xlu1 %v647_v3, %s971_s4 }
 0x46d   :  { %665 = vrot.lane.b32.xlu1 %v648_v4, %s971_s4 }
 0x471   :  { %667 = vrot.lane.b32.xlu1 %v649_v5, %s971_s4 }
 0x475   :  { %671 = vrot.lane.b32.xlu1 %v651_v8, %s971_s4 }
 0x479   :  { %675 = vrot.lane.b32.xlu1 %v653_v9, %s971_s4 }
 0x4bf   :  { %v626_v10 = vpop.permute.xlu0 %625  ;;  %v616_v11 = vpop.permute.xlu1 %615 }
 0x4c0   :  { %v644_v17 = vadd.f32 %v626_v10, %v596_v16  ;;  %v639_v32 = vadd.f32 %v616_v11, %v591_v29 }
 0x4c3   :  { %v670_v12 = vpop.permute.xlu0 %669  ;;  %v618_v13 = vpop.permute.xlu1 %617 }
 0x4c4   :  { %v640_v38 = vadd.f32 %v618_v13, %v592_v35 }
 0x4c7   :  { %v674_v44 = vpop.permute.xlu0 %673  ;;  %v620_v18 = vpop.permute.xlu1 %619 }
 0x4c8   :  { %v692_v19 = vadd.f32 %v674_v44, %v644_v17  ;;  %v641_v55 = vadd.f32 %v620_v18, %v593_v54 }
 0x4ca   :  { %v700_v21 = vmul.f32 %v968_v20, %v692_v19 }
 0x4cb   :  { %v622_v23 = vpop.permute.xlu1 %621  ;;  %v678_v31 = vpop.permute.xlu0 %677 }
 0x4cc   :  { %709 = vst.msk [vmem:[%s1349_s3 + $0x28] sm:$0xff] %vm703_vm11, %v700_v21  ;;  %v642_v24 = vadd.f32 %v622_v23, %v594_v22 }
 0x4ce   :  { %v690_v25 = vadd.f32 %v670_v12, %v642_v24 }
 0x4cf   :  { %v624_v26 = vpop.permute.xlu1 %623 }
 0x4d0   :  { %v698_v7 = vmul.f32 %v968_v20, %v690_v25  ;;  %v643_v46 = vadd.f32 %v624_v26, %v595_v43 }
 0x4d2   :  { %707 = vst.msk [vmem:[%s1349_s3 + $0x18] sm:$0xff] %vm703_vm11, %v698_v7 }
 0x4d3   :  { %v628_v27 = vpop.permute.xlu1 %627 }
 0x4d4   :  { %v645_v51 = vadd.f32 %v628_v27, %v597_v49 }
 0x4d7   :  { %v630_v63 = vpop.permute.xlu1 %629 }
 0x4d8   :  { %v646_v30 = vadd.f32 %v630_v63, %v598_v28 }
 0x4da   :  { %v694_v33 = vadd.f32 %v678_v31, %v646_v30 }
 0x4db   :  { %v664_v34 = vpop.permute.xlu1 %663 }
 0x4dc   :  { %v702_v36 = vmul.f32 %v968_v20, %v694_v33  ;;  %v687_v37 = vadd.f32 %v664_v34, %v639_v32 }
 0x4de   :  { %711 = vst.msk [vmem:[%s1349_s3 + $0x38] sm:$0xff] %vm703_vm11, %v702_v36  ;;  %v695_v15 = vmul.f32 %v968_v20, %v687_v37 }
 0x4df   :  { %v666_v39 = vpop.permute.xlu1 %665 }
 0x4e0   :  { %704 = vst.msk [vmem:[%s1349_s3] sm:$0xff] %vm703_vm11, %v695_v15  ;;  %v688_v40 = vadd.f32 %v666_v39, %v640_v38 }
 0x4e2   :  { %v696_v41 = vmul.f32 %v968_v20, %v688_v40 }
 0x4e3   :  { %v668_v42 = vpop.permute.xlu1 %667 }
 0x4e4   :  { %705 = vst.msk [vmem:[%s1349_s3 + $0x8] sm:$0xff] %vm703_vm11, %v696_v41  ;;  %v689_v45 = vadd.f32 %v668_v42, %v641_v55 }
 0x4e6   :  { %v697_v62 = vmul.f32 %v968_v20, %v689_v45 }
 0x4e7   :  { %v672_v47 = vpop.permute.xlu1 %671 }
 0x4e8   :  { %706 = vst.msk [vmem:[%s1349_s3 + $0x10] sm:$0xff] %vm703_vm11, %v697_v62  ;;  %v691_v50 = vadd.f32 %v672_v47, %v643_v46 }
 0x4ea   :  { %v699_v6 = vmul.f32 %v968_v20, %v691_v50 }
 0x4eb   :  { %v676_v52 = vpop.permute.xlu1 %675 }
 0x4ec   :  { %708 = vst.msk [vmem:[%s1349_s3 + $0x20] sm:$0xff] %vm703_vm11, %v699_v6  ;;  %v693_v53 = vadd.f32 %v676_v52, %v645_v51 }
 0x4ee   :  { %v701_v56 = vmul.f32 %v968_v20, %v693_v53 }
 0x4f0   :  { %710 = vst.msk [vmem:[%s1349_s3 + $0x30] sm:$0xff] %vm703_vm11, %v701_v56 }

</bundles_post_ra>
